<compile_context>
chip_gen: v6e
topology: v6e:2x2x1
jax: 0.10.0
libtpu: 0.0.40
codegen_flags: <defaults>
</compile_context>

<pallas_src>
import functools

import jax
import jax.numpy as jnp
from jax.experimental import pallas as pl
from jax.experimental.pallas import tpu as pltpu


def _spatial_attn_kernel(x_ref, mboth_ref, bst_ref, vst_ref, out_ref,
                         *, nb, nv, nt, approx_recip):
    """One grid step over `nb` batches.

    x_ref:     (nb*nv, F*T)  flattened input block (rows = (batch, vertex))
    mboth_ref: (F*T, 2*nt)   fused [W1xW2 | W3xI] projection
    bst_ref:   (nv, nv)      bs transposed (f32)
    vst_ref:   (nv, nv)      Vs transposed (compute dtype)
    out_ref:   (nb*nv, nv)   [(b*nv + j), i] = softmax(S)[b, i, j]
    """
    x2 = x_ref[...]                                                     # (nb*nv, FT)

    # One fused MXU matmul for both projections, M = nb*nv rows, width 2T lanes.
    proj = jnp.dot(x2, mboth_ref[...],
                   preferred_element_type=jnp.float32)                  # (nb*nv, 2T)
    lhs = proj[:, :nt].reshape(nb, nv, nt)                              # (nb, nv, T)
    rhs = proj[:, nt:].reshape(nb, nv, nt)                              # (nb, nv, T)

    # product^T:  product_t[b, j, m] = product[b, m, j] = sum_t lhs[b,m,t]*rhs[b,j,t]
    product_t = jax.lax.dot_general(
        rhs, lhs, (((2,), (2,)), ((0,), (0,))),
        preferred_element_type=jnp.float32)                             # (nb, nv, nv)

    sig_t = jax.nn.sigmoid(product_t + bst_ref[...])                    # (nb, nv, nv)

    # S^T as one flat 2-D matmul against the pre-transposed Vs (already (K, N)):
    #   s_t[(b,j), i] = sum_m sig_t[b,j,m] * Vs[i,m]
    sig2 = sig_t.reshape(nb * nv, nv).astype(vst_ref.dtype)
    s_t = jnp.dot(sig2, vst_ref[...],
                  preferred_element_type=jnp.float32)                   # (nb*nv, nv)

    # softmax over i (lane axis) == softmax over dim=1 of (B, N, N)
    s_t = s_t - jnp.max(s_t, axis=-1, keepdims=True)
    e = jnp.exp(s_t)
    denom = jnp.sum(e, axis=-1, keepdims=True)
    inv = pl.reciprocal(denom, approx=approx_recip)                     # EUP slot
    out_ref[...] = (e * inv).astype(out_ref.dtype)


def spatial_attention(x, w1, w2, w3, bs, vs, *, batch_block=128,
                      compute_dtype=jnp.bfloat16,
                      vmem_budget_bytes=24 << 20):
    """x: (B, N, F, T); returns (B, N, N) = softmax_dim1(Vs @ sigmoid(lhs@rhs + bs))."""
    B, N, F, T = x.shape
    FT = F * T

    # Wrapper-side precompute of the tiny fused projection weights:
    #   m_lhs[f*T + t, t'] = W1[t] * W2[f, t']     -> lhs = x2d @ m_lhs
    #   m_rhs[f*T + t, t'] = W3[f] * delta(t, t')  -> rhs = x2d @ m_rhs
    m_lhs = (w1[None, :, None] * w2[:, None, :]).reshape(FT, T)
    m_rhs = (w3[:, None, None] *
             jnp.eye(T, dtype=jnp.float32)[None, :, :]).reshape(FT, T)
    m_both = jnp.concatenate([m_lhs, m_rhs], axis=1).astype(compute_dtype)   # (FT, 2T)

    bs_t = bs.reshape(N, N).T.astype(jnp.float32)     # stays f32 (added to f32 product)
    vs_t = vs.T.astype(compute_dtype)                 # pre-transposed -> (K, N) layout

    x_bytes = jnp.dtype(compute_dtype).itemsize

    # Per-batch VMEM footprint: double-buffered x block + double-buffered out
    # block + live f32 intermediates (proj, product_t, sig, s_t/e).
    per_batch = (2 * N * FT * x_bytes          # x block, 2 pipeline buffers
                 + 2 * N * N * 4               # out block, 2 pipeline buffers
                 + N * 2 * T * 4               # proj
                 + 4 * N * N * 4)              # product_t / sig / s_t / e
    nb_cap = max(1, int(vmem_budget_bytes) // per_batch)

    # Batch blocking: as many batches per grid step as the budget allows, but
    # keep >= 2 grid blocks when B > 1 so dimension_semantics=("parallel",)
    # can shard the batch axis across both v7x TensorCores.
    nb = 1 if B <= 1 else min(batch_block, nb_cap, pl.cdiv(B, 2))
    n_blocks = pl.cdiv(B, nb)
    b_pad = n_blocks * nb

    x2 = x.reshape(B * N, FT).astype(compute_dtype)
    if b_pad != B:
        x2 = jnp.pad(x2, ((0, (b_pad - B) * N), (0, 0)))

    kernel = functools.partial(
        _spatial_attn_kernel, nb=nb, nv=N, nt=T,
        approx_recip=(jnp.dtype(compute_dtype) != jnp.dtype(jnp.float32)))

    cost = pl.CostEstimate(
        flops=b_pad * (2 * N * FT * 2 * T + 2 * N * N * T + 2 * N * N * N),
        transcendentals=2 * b_pad * N * N,
        bytes_accessed=(x_bytes * b_pad * N * FT + 4 * b_pad * N * N
                        + x_bytes * (FT * 2 * T + N * N) + 4 * N * N),
    )

    out_flat = pl.pallas_call(
        kernel,
        out_shape=jax.ShapeDtypeStruct((b_pad * N, N), jnp.float32),
        grid_spec=pltpu.PrefetchScalarGridSpec(
            num_scalar_prefetch=0,
            grid=(n_blocks,),
            in_specs=[
                pl.BlockSpec((nb * N, FT), lambda b: (b, 0)),
                pl.BlockSpec((FT, 2 * T), lambda b: (0, 0)),
                pl.BlockSpec((N, N), lambda b: (0, 0)),
                pl.BlockSpec((N, N), lambda b: (0, 0)),
            ],
            out_specs=pl.BlockSpec((nb * N, N), lambda b: (b, 0)),
        ),
        compiler_params=pltpu.CompilerParams(
            dimension_semantics=("parallel",)),
        cost_estimate=cost,
    )(x2, m_both, bs_t, vs_t)

    # Rows are (batch, j); lanes hold i: out_flat[b*N + j, i] = softmax(S)[b, i, j].
    # Tiny un-transpose is wrapper-side layout plumbing.
    out = out_flat[: B * N].reshape(B, N, N)
    return jnp.swapaxes(out, 1, 2)


def spatial_attention_ref(x, w1, w2, w3, bs, vs):
    """Pure-JAX reference matching the PyTorch forward."""
    lhs = jnp.einsum("bnft,t->bnf", x, w1)
    lhs = jnp.einsum("bnf,ft->bnt", lhs, w2)
    rhs = jnp.einsum("f,bnft->bnt", w3, x)              # (B, N, T)
    product = jnp.einsum("bnt,bmt->bnm", lhs, rhs)      # (B, N, N)
    S = jnp.einsum("nm,bmk->bnk", vs, jax.nn.sigmoid(product + bs))
    return jax.nn.softmax(S, axis=1)


if __name__ == "__main__":
    B, N, F, T = 2, 16, 4, 8
    key = jax.random.PRNGKey(0)
    kx, k1, k2, k3, kb, kv = jax.random.split(key, 6)

    x = jax.random.normal(kx, (B, N, F, T), dtype=jnp.float32)
    # Parameters created lazily in PyTorch's forward via torch.randn; mirror
    # that with deterministic normal init here.
    W1 = jax.random.normal(k1, (T,), dtype=jnp.float32)
    W2 = jax.random.normal(k2, (F, T), dtype=jnp.float32)
    W3 = jax.random.normal(k3, (F,), dtype=jnp.float32)
    bs = jax.random.normal(kb, (1, N, N), dtype=jnp.float32)
    Vs = jax.random.normal(kv, (N, N), dtype=jnp.float32)

    ref = spatial_attention_ref(x, W1, W2, W3, bs, Vs)

    # Strict correctness check on the exact (f32) compute path.
    out_f32 = spatial_attention(x, W1, W2, W3, bs, Vs, compute_dtype=jnp.float32)
    out_f32 = jax.block_until_ready(out_f32)
    assert out_f32.shape == (B, N, N)
    assert jnp.allclose(out_f32, ref, atol=1e-4, rtol=1e-4), "f32 path mismatch"

    # Default fast path: bf16 MXU inputs, f32 accumulation; looser tolerance
    # accounts for bf16 input quantization (per review).
    out = spatial_attention(x, W1, W2, W3, bs, Vs)
    out = jax.block_until_ready(out)
    assert out.shape == (B, N, N)
    assert jnp.allclose(out, ref, atol=5e-2, rtol=5e-2), "bf16 path mismatch"

    print("KERNEL_OK")
</pallas_src>

<mosaic_0001>
module attributes {stable_mosaic.version = 11 : i64} {
  func.func @_spatial_attn_kernel(%arg0: i32, %arg1: memref<16x32xf32, #tpu.memory_space<vmem>>, %arg2: memref<32x16xf32, #tpu.memory_space<vmem>>, %arg3: memref<16x16xf32, #tpu.memory_space<vmem>>, %arg4: memref<16x16xf32, #tpu.memory_space<vmem>>, %arg5: memref<16x16xf32, #tpu.memory_space<vmem>>) attributes {dimension_semantics = [#tpu.dimension_semantics<parallel>], iteration_bounds = array<i64: 2>, scalar_prefetch = 0 : i64, scratch_operands = 0 : i64, tpu.core_type = #tpu.core_type<tc>, window_params = [{transform_indices = @transform_0, window_bounds = array<i64: 16, 32>}, {pipeline_mode = #tpu.pipeline_mode<synchronous>, transform_indices = @transform_1, window_bounds = array<i64: 32, 16>}, {pipeline_mode = #tpu.pipeline_mode<synchronous>, transform_indices = @transform_2, window_bounds = array<i64: 16, 16>}, {pipeline_mode = #tpu.pipeline_mode<synchronous>, transform_indices = @transform_3, window_bounds = array<i64: 16, 16>}, {transform_indices = @transform_4, window_bounds = array<i64: 16, 16>}]} {
    %c0 = arith.constant 0 : index
    %c0_0 = arith.constant 0 : index
    %0 = vector.load %arg1[%c0, %c0_0] : memref<16x32xf32, #tpu.memory_space<vmem>>, vector<16x32xf32>
    %c0_1 = arith.constant 0 : index
    %c0_2 = arith.constant 0 : index
    %1 = vector.load %arg2[%c0_1, %c0_2] : memref<32x16xf32, #tpu.memory_space<vmem>>, vector<32x16xf32>
    %cst = arith.constant dense<0.000000e+00> : vector<16x16xf32>
    %2 = tpu.matmul %0, %1, %cst {dimension_numbers = #tpu.dot_dimension_numbers<[1], [0], [0], [1], [0, 0, 1, 1], [], []>} : vector<16x32xf32>, vector<32x16xf32>, vector<16x16xf32> -> vector<16x16xf32>
    %3 = vector.extract_strided_slice %2 {offsets = [0, 0], sizes = [16, 8], strides = [1, 1]} : vector<16x16xf32> to vector<16x8xf32>
    %4 = vector.shape_cast %3 : vector<16x8xf32> to vector<1x16x8xf32>
    %5 = vector.extract_strided_slice %2 {offsets = [0, 8], sizes = [16, 8], strides = [1, 1]} : vector<16x16xf32> to vector<16x8xf32>
    %6 = vector.shape_cast %5 : vector<16x8xf32> to vector<1x16x8xf32>
    %cst_3 = arith.constant dense<0.000000e+00> : vector<1x16x16xf32>
    %7 = tpu.matmul %6, %4, %cst_3 {dimension_numbers = #tpu.dot_dimension_numbers<[2], [2], [1], [1], [0, 0, 0, 1, 1, 1], [0], [0]>} : vector<1x16x8xf32>, vector<1x16x8xf32>, vector<1x16x16xf32> -> vector<1x16x16xf32>
    %c0_4 = arith.constant 0 : index
    %c0_5 = arith.constant 0 : index
    %8 = vector.load %arg3[%c0_4, %c0_5] : memref<16x16xf32, #tpu.memory_space<vmem>>, vector<16x16xf32>
    %9 = vector.shape_cast %8 : vector<16x16xf32> to vector<1x16x16xf32>
    %10 = arith.addf %7, %9 : vector<1x16x16xf32>
    %11 = arith.negf %10 : vector<1x16x16xf32>
    %12 = math.exp %11 : vector<1x16x16xf32>
    %cst_6 = arith.constant 1.000000e+00 : f32
    %13 = vector.broadcast %cst_6 : f32 to vector<1x16x16xf32>
    %14 = arith.addf %13, %12 : vector<1x16x16xf32>
    %15 = arith.divf %13, %14 : vector<1x16x16xf32>
    %16 = vector.shape_cast %15 : vector<1x16x16xf32> to vector<16x16xf32>
    %c0_7 = arith.constant 0 : index
    %c0_8 = arith.constant 0 : index
    %17 = vector.load %arg4[%c0_7, %c0_8] : memref<16x16xf32, #tpu.memory_space<vmem>>, vector<16x16xf32>
    %cst_9 = arith.constant dense<0.000000e+00> : vector<16x16xf32>
    %18 = tpu.matmul %16, %17, %cst_9 {dimension_numbers = #tpu.dot_dimension_numbers<[1], [0], [0], [1], [0, 0, 1, 1], [], []>} : vector<16x16xf32>, vector<16x16xf32>, vector<16x16xf32> -> vector<16x16xf32>
    %cst_10 = arith.constant dense<0xFF800000> : vector<16xf32>
    %19 = vector.multi_reduction <maximumf>, %18, %cst_10 [1] : vector<16x16xf32> to vector<16xf32>
    %20 = vector.shape_cast %19 : vector<16xf32> to vector<16x1xf32>
    %21 = vector.broadcast %20 : vector<16x1xf32> to vector<16x16xf32>
    %22 = arith.subf %18, %21 : vector<16x16xf32>
    %23 = math.exp %22 : vector<16x16xf32>
    %cst_11 = arith.constant dense<0.000000e+00> : vector<16xf32>
    %24 = vector.multi_reduction <add>, %23, %cst_11 [1] : vector<16x16xf32> to vector<16xf32>
    %25 = vector.shape_cast %24 : vector<16xf32> to vector<16x1xf32>
    %26 = tpu.reciprocal %25 : vector<16x1xf32> -> vector<16x1xf32>
    %27 = vector.broadcast %26 : vector<16x1xf32> to vector<16x16xf32>
    %28 = arith.mulf %23, %27 : vector<16x16xf32>
    %c0_12 = arith.constant 0 : index
    %c0_13 = arith.constant 0 : index
    %29 = vector.load %arg5[%c0_12, %c0_13] : memref<16x16xf32, #tpu.memory_space<vmem>>, vector<16x16xf32>
    tpu.vector_store %arg5[%c0_12, %c0_13], %28 {strides = array<i32>} : memref<16x16xf32, #tpu.memory_space<vmem>>, vector<16x16xf32>,
    return
  }
  func.func @transform_0(%arg0: i32) -> (i32, i32) {
    %c0_i32 = arith.constant 0 : i32
    %c0_i32_0 = arith.constant 0 : i32
    return %arg0, %c0_i32 : i32, i32
  }
  func.func @transform_1(%arg0: i32) -> (i32, i32) {
    %c0_i32 = arith.constant 0 : i32
    %c0_i32_0 = arith.constant 0 : i32
    %c0_i32_1 = arith.constant 0 : i32
    return %c0_i32, %c0_i32_0 : i32, i32
  }
  func.func @transform_2(%arg0: i32) -> (i32, i32) {
    %c0_i32 = arith.constant 0 : i32
    %c0_i32_0 = arith.constant 0 : i32
    %c0_i32_1 = arith.constant 0 : i32
    return %c0_i32, %c0_i32_0 : i32, i32
  }
  func.func @transform_3(%arg0: i32) -> (i32, i32) {
    %c0_i32 = arith.constant 0 : i32
    %c0_i32_0 = arith.constant 0 : i32
    %c0_i32_1 = arith.constant 0 : i32
    return %c0_i32, %c0_i32_0 : i32, i32
  }
  func.func @transform_4(%arg0: i32) -> (i32, i32) {
    %c0_i32 = arith.constant 0 : i32
    %c0_i32_0 = arith.constant 0 : i32
    return %arg0, %c0_i32 : i32, i32
  }
}

</mosaic_0001>

<bundles_post_ra>
// kernel: tpu_custom_call.1
= control target key start
LH: loop header
LB: loop body
LE: loop exit
PB: predicated region body
PF: predicated region fallthrough
CT: control target
= control target key end

     0   :  { %9 = vsyncpa [#allocation3], 0  ;;  %s751_s15 = smov 0   ;;  %s824_s0 = inlined_call_operand.vmem [shape: f32[32,32], index: 0, kind: input, shape index: {}]   ;;  %s825_s1 = inlined_call_operand.vmem [shape: f32[32,16], index: 1, kind: input, shape index: {}]   ;;  %s826_s2 = inlined_call_operand.vmem [shape: f32[16,16], index: 2, kind: input, shape index: {}]   ;;  %s827_s3 = inlined_call_operand.hbm [shape: f32[16,16], index: 3, kind: input, shape index: {}]   ;;  %s828_s4 = inlined_call_operand.vmem [shape: f32[32,16], index: 4, kind: output, shape index: {}]  }
   0x1 LB: > { %s584_s16 = sadd.s32 4294967295, %s720_s15   ;;  %p586_p0 = scmp.ge.s32.totalorder %s720_s15, 1  ;;  %s720_s15 = sphi %s751_s15, %s15_s15  }
   0x2   : > { %p135_p1 = scmp.lt.s32.totalorder %s720_s15, 3  ;;  %s722_s17 = smov [#allocation2]  }
   0x3   : > { %s153_s18 = sshll.u32 %s722_s17, 4  ;;  %p763_p3 = scmp.eq.s32.totalorder %s584_s16, 0  ;;  %s154_s18 = int_to_ptr.vmem [resolvable:$true] %s153_s18 }
   0x4   : > { %p759_p2 = pnand %p586_p0, %p135_p1  ;;  %s695_s21 = scalar_lea.vmem %s154_s18, 256 }
   0x5   : > { %p696_p7 = scmp.ne.s32.totalorder %s154_s18, %s695_s21  ;;  %p703_p10 = scmp.lt.s32.totalorder %s154_s18, %s154_s18 }
   0x6   : > { %p650_p4 = pneg %p759_p2  ;;  %p704_p11 = scmp.lt.s32.totalorder %s695_s21, %s695_s21 }
   0x8   : > { %p651_p5 = pnand %p763_p3, %p650_p4  ;;  %p705_p12 = por %p704_p11, %p703_p10 }
   0xa   : > { %p686_p6 = pneg %p651_p5 }
   0xc   : > { %p698_p8 = pnand %p696_p7, %p686_p6 }
   0xe   : > { %p699_p9 = pneg %p698_p8 }
  0x10   : > { %p706_p13 = pnand %p705_p12, %p699_p9 }
  0x12   : > { %709 = shalt.err (!%p706_p13)
}
  0x13   : > { %s723_s22 = smov 128   ;;  %s724_s23 = smov 8  }
  0x14   : > { %653 = dma.hbm_to_vmem [thread:$0]  (!%p651_p5), %s827_s3, 256, %s154_s18, [#allocation3], %s723_s22, %s723_s22, %s724_s23  }
  0x15   : > { %178 = sbr.rel (%p759_p2) target bundleno = 1092 (0x444), region = 36 }
  0x1a   : > { %715 = dma.done.wait (%p763_p3), [#allocation3], 256  }
  0x1b   : > { %717 = vsyncadd (%p763_p3), [#allocation3], 4294967040  ;;  %s591_s26 = sshll.u32 %s584_s16, 1  ;;  %vm222_vm0 = vcmask 261120   ;;  %v221_v0 = vld [vmem:[%s825_s1 + $0x18] sm:$0xff]  ;;  %v220_v1 = vld [vmem:[%s825_s1 + $0x10] sm:$0xff] }
  0x1c   : > { %p205_p0 = scmp.lt.s32.totalorder %s591_s26, 3  ;;  %621 = vmatprep.subr.mxu0 %v221_v0  ;;  %v219_v3 = vld [vmem:[%s825_s1 + $0x8] sm:$0xff]  ;;  %v218_v4 = vld [vmem:[%s825_s1] sm:$0xff]  ;;  %vm312_vm1 = vcmask 64512   ;;  %s725_s13 = smov 120   ;;  %vm410_vm2 = vcmask 130048  }
  0x1d   : > { %622 = vmatpush3.msra.mxu0 %v221_v0  ;;  %v409_v10 = vld [vmem:[#allocation2 + $0x8] sm:$0xff]  ;;  %v408_v11 = vld [vmem:[#allocation2] sm:$0xff] }
  0x1e   : > { %s832_s26 = smov (!%p205_p0, %s591_s26), 3  ;;  %623 = vmatprep.subr.mxu0 %v220_v1  ;;  %v305_v12 = vld [vmem:[%s826_s2 + $0x8] sm:$0xff]  ;;  %v304_v14 = vld [vmem:[%s826_s2] sm:$0xff] }
  0x1f   : > { %s592_s27 = sshll.u32 %s832_s26, 3  ;;  %624 = vmatpush3.msra.mxu0 %v220_v1 }
  0x20   : > { %s208_s30 = scalar_lea.vmem %s824_s0, %s592_s27  ;;  %625 = vmatprep.subr.mxu0 %v219_v3  ;;  %s214_s21 = scalar_lea.vmem %s828_s4, %s592_s27 }
  0x21   : > { %v216_v2 = vld [vmem:[%s208_s30] sm:$0xff]  ;;  %626 = vmatpush3.msra.mxu0 %v219_v3  ;;  %v217_v5 = vld [vmem:[%s208_s30 + $0x8] sm:$0xff] }
  0x22   : > { %629 = vmatprep.mubr.msk.f32.mxu0 %vm222_vm0, %v216_v2  ;;  %627 = vmatprep.subr.mxu0 %v218_v4 }
  0x23   : > { %628 = vmatpush3.msra.mxu0 %v218_v4 }
  0x24   : > { %630 = vmatmul.mubr.msk.f32.vlgmr.msra.gmra.mxu0 %vm222_vm0, %v217_v5  ;;  %639 = vmatprep.subr.mxu0 %v409_v10 }
  0x25   : > { %640 = vmatpush3.msra.mxu0 %v409_v10 }
  0x26   : > { %641 = vmatprep.subr.mxu0 %v408_v11 }
  0x27   : > { %642 = vmatpush3.msra.mxu0 %v408_v11 }
  0xe4   : > { %v631_v6 = vpop.f32.mrf.mxu0 }
  0xe5   : > { %632 = vmatprep.subr.msk.mxu1 %vm312_vm1, %v631_v6 }
  0xe6   : > { %v295_v7 = vpop.f32.mrf.mxu0  ;;  %633 = vmatpush3.xpose.msk.msra.mxu1 %vm312_vm1, %v631_v6 }
  0xe7   : > { %308 = vrot.lane.b32.xlu0 %v295_v7, %s725_s13  ;;  %634 = vmatprep.subr.msk.mxu1 %vm312_vm1, %v295_v7 }
  0xea   : > { %635 = vmatpush3.xpose.msk.msra.mxu1 %vm312_vm1, %v295_v7 }
  0xeb   : > { %310 = vrot.lane.b32.xlu0 %v631_v6, %s725_s13 }
 0x159   : > { %v309_v8 = vpop.permute.xlu0 %308 }
 0x15a   : > { %636 = vmatprep.mubr.msk.f32.mxu1 %vm312_vm1, %v309_v8 }
 0x15d   : > { %v311_v9 = vpop.permute.xlu0 %310 }
 0x15e   : > { %637 = vmatmul.mubr.msk.f32.vlgmr.msra.gmra.mxu1 %vm312_vm1, %v311_v9 }
 0x21e   : > { %v638_v13 = vpop.f32.mrf.mxu1 }
 0x21f   : > { %v393_v15 = vadd.f32 %v638_v13, %v305_v12 }
 0x220   : > { %v387_v16 = vpop.f32.mrf.mxu1 }
 0x221   : > { %v602_v17 = vmul.f32 -1.442695, %v393_v15  ;;  %v388_v18 = vadd.f32 %v387_v16, %v304_v14 }
 0x223   : > { %668 = vpow2.f32 %v602_v17  ;;  %v601_v19 = vmul.f32 -1.442695, %v388_v18 }
 0x225   : > { %670 = vpow2.f32 %v601_v19 }
 0x230   : > { %v669_v20 = vpop.eup %668 }
 0x231   : > { %v403_v22 = vadd.f32 1.0, %v669_v20 }
 0x232   : > { %v671_v21 = vpop.eup %670 }
 0x233   : > { %v402_v23 = vadd.f32 1.0, %v671_v21 }
 0x235   : > { %672 = vrcp.f32 %v402_v23 }
 0x236   : > { %674 = vrcp.f32 %v403_v22 }
 0x242   : > { %v673_v24 = vpop.eup %672 }
 0x243   : > { %v675_v25 = vpop.eup %674  ;;  %643 = vmatprep.mubr.msk.f32.mxu0 %vm410_vm2, %v673_v24 }
 0x244   : > { %644 = vmatmul.mubr.msk.f32.vlgmr.msra.gmra.mxu0 %vm410_vm2, %v675_v25 }
 0x304   : > { %v645_v26 = vpop.f32.mrf.mxu0 }
 0x305   : > { %v495_v29 = vsel %vm410_vm2, %v645_v26, -inf }
 0x306   : > { %v483_v27 = vpop.f32.mrf.mxu0 }
 0x307   : > { %v492_v28 = vsel %vm410_vm2, %v483_v27, -inf }
 0x308   : > { %493 = vmax.xlane.f32.xlu1 %v492_v28 }
 0x30c   : > { %496 = vmax.xlane.f32.xlu1 %v495_v29 }
 0x391   : > { %v494_v30 = vpop.xlane.xlu1 %493 }
 0x392   : > { %v498_v31 = vsub.f32 %v483_v27, %v494_v30 }
 0x394   : > { %v500_v32 = vmul.f32 1.442695, %v498_v31 }
 0x395   : > { %v497_v33 = vpop.xlane.xlu1 %496 }
 0x396   : > { %676 = vpow2.f32 %v500_v32  ;;  %v499_v34 = vsub.f32 %v645_v26, %v497_v33 }
 0x398   : > { %v502_v35 = vmul.f32 1.442695, %v499_v34 }
 0x39a   : > { %678 = vpow2.f32 %v502_v35 }
 0x3a3   : > { %v677_v36 = vpop.eup %676 }
 0x3a4   : > { %v504_v37 = vsel %vm410_vm2, %v677_v36, 0.0 }
 0x3a5   : > { %505 = vadd.xlane.f32.xlu0 %v504_v37 }
 0x3a7   : > { %v679_v38 = vpop.eup %678 }
 0x3a8   : > { %v507_v39 = vsel %vm410_vm2, %v679_v38, 0.0 }
 0x3a9   : > { %508 = vadd.xlane.f32.xlu1 %v507_v39 }
 0x42e   : > { %v506_v40 = vpop.xlane.xlu0 %505 }
 0x42f   : > { %680 = vrcp.f32 %v506_v40 }
 0x432   : > { %v509_v41 = vpop.xlane.xlu1 %508 }
 0x433   : > { %682 = vrcp.f32 %v509_v41 }
 0x43c   : > { %v681_v42 = vpop.eup %680 }
 0x43d   : > { %v512_v43 = vmul.f32 %v681_v42, %v677_v36 }
 0x43f   : > { %514 = vst.msk [vmem:[%s214_s21] sm:$0xff] %vm410_vm2, %v512_v43 }
 0x440   : > { %v683_v44 = vpop.eup %682 }
 0x441   : > { %v513_v45 = vmul.f32 %v683_v44, %v679_v38 }
 0x443   : > { %515 = vst.msk [vmem:[%s214_s21 + $0x8] sm:$0xff] %vm410_vm2, %v513_v45 }
 0x444 PF: > { %s15_s15 = sadd.s32 1, %s720_s15  }
 0x445   : > { %p12_p1 = scmp.ge.s32.totalorder %s15_s15, 4  }
 0x447   :  { %14 = sbr.rel (!%p12_p1) target bundleno = 1 (0x1), region = 71 }
 0x44c   :  { %538 = vsyncpa [#allocation3], 1 }
 0x44d   :  { %540 = vsyncpa [#allocation3 + $0x1], 1 }

</bundles_post_ra>
